<compile_context>
chip_gen: v7x
topology: tpu7x:2x2x1
jax: 0.10.0
libtpu: 0.0.40
codegen_flags: <defaults>
</compile_context>

<pallas_src>
import functools

import jax
import jax.numpy as jnp
from jax.experimental import pallas as pl
from jax.experimental.pallas import tpu as pltpu


def _round_up(v, m):
    return (v + m - 1) // m * m


def _coupling_fwd_kernel(x_ref, w1_ref, b1_ref, w2s_ref, b2s_ref,
                         w2t_ref, b2t_ref, y_ref, logdet_ref,
                         *, half, hidden_p):
    x = x_ref[...]
    x1 = x[:, :half]
    x2 = x[:, half:]

    # Fused first layers of scale_net and translate_net: one MXU pass over
    # W1 = [w1s | w1t]; the split point hidden_p is a multiple of 128, so
    # h_s / h_t are lane-aligned views.
    h = jnp.dot(x1, w1_ref[...], preferred_element_type=jnp.float32) + b1_ref[...]
    h = jnp.maximum(h, 0.0)
    h_s = h[:, :hidden_p]
    h_t = h[:, hidden_p:]

    # scale_net second layer + Tanh
    s = jnp.tanh(jnp.dot(h_s, w2s_ref[...], preferred_element_type=jnp.float32)
                 + b2s_ref[...])
    # translate_net second layer
    t = (jnp.dot(h_t, w2t_ref[...], preferred_element_type=jnp.float32)
         + b2t_ref[...])

    y2 = x2.astype(jnp.float32) * jnp.exp(s) + t

    # Write both halves directly into the output block (no concatenate copy).
    y_ref[:, :half] = x1.astype(y_ref.dtype)
    y_ref[:, half:] = y2.astype(y_ref.dtype)
    logdet_ref[...] = jnp.sum(s, axis=1, keepdims=True)


def coupling_layer_forward(x, params, *, tb_max=512, interpret=False):
    """Forward (invert=False) of CouplingLayer. Returns (y, log_det)."""
    B, dim = x.shape
    assert dim % 2 == 0, "CouplingLayer requires an even feature dim"
    half = dim // 2
    hidden = params["w1s"].shape[1]
    hidden_p = _round_up(hidden, 128)  # lane-aligned split + MXU fill (exact math)

    dtype = x.dtype

    # ---- pack / zero-pad weights (padded hidden units contribute exactly 0) ----
    def pad_cols(w):
        return jnp.pad(w, ((0, 0), (0, hidden_p - hidden)))

    def pad_rows(w):
        return jnp.pad(w, ((0, hidden_p - hidden), (0, 0)))

    w1 = jnp.concatenate([pad_cols(params["w1s"]), pad_cols(params["w1t"])], axis=1)
    b1 = jnp.concatenate([jnp.pad(params["b1s"], (0, hidden_p - hidden)),
                          jnp.pad(params["b1t"], (0, hidden_p - hidden))])[None, :]
    w2s = pad_rows(params["w2s"])
    w2t = pad_rows(params["w2t"])
    b2s = params["b2s"][None, :]
    b2t = params["b2t"][None, :]

    # ---- batch tiling ----
    # Keep double-buffered x + y tiles under ~8 MiB so the tile is legal even
    # under v5e's 16 MiB scoped-VMEM default (and v7x's 32 MiB / 64 MiB phys).
    bytes_per_row = 4 * dim * 4  # x tile + y tile, double-buffered, f32
    tb_cap = max(8, (8 * 1024 * 1024 // bytes_per_row) // 8 * 8)
    TB = min(tb_max, tb_cap)
    if B <= TB:
        TB = B          # single block == full array: always a legal block shape
        Bp = B
    else:
        Bp = _round_up(B, TB)  # pad so blocks divide the batch exactly

    xp = x if Bp == B else jnp.pad(x, ((0, Bp - B), (0, 0)))
    grid = (Bp // TB,)

    kernel = functools.partial(_coupling_fwd_kernel, half=half, hidden_p=hidden_p)

    def const_spec(shape):
        return pl.BlockSpec(shape, lambda i: (0, 0))  # VMEM-resident across grid

    y, logdet = pl.pallas_call(
        kernel,
        grid=grid,
        in_specs=[
            pl.BlockSpec((TB, dim), lambda i: (i, 0)),   # x, row-tiled
            const_spec(w1.shape), const_spec(b1.shape),
            const_spec(w2s.shape), const_spec(b2s.shape),
            const_spec(w2t.shape), const_spec(b2t.shape),
        ],
        out_specs=[
            pl.BlockSpec((TB, dim), lambda i: (i, 0)),   # y, row-tiled
            pl.BlockSpec((TB, 1), lambda i: (i, 0)),     # log-det, row-tiled
        ],
        out_shape=(
            jax.ShapeDtypeStruct((Bp, dim), dtype),
            jax.ShapeDtypeStruct((Bp, 1), jnp.float32),
        ),
        compiler_params=pltpu.CompilerParams(
            dimension_semantics=("parallel",)),          # megacore-shard on v7x
        interpret=interpret,
    )(xp, w1, b1, w2s, b2s, w2t, b2t)

    return y[:B], logdet[:B, 0]


def init_params(key, dim, hidden_dim=64, dtype=jnp.float32):
    """Deterministic init matching PyTorch Linear shapes (weights stored as (in, out))."""
    half = dim // 2
    ks = jax.random.split(key, 8)

    def linear(kw, kb, fan_in, fan_out):
        bound = 1.0 / jnp.sqrt(fan_in)
        w = jax.random.uniform(kw, (fan_in, fan_out), dtype, -bound, bound)
        b = jax.random.uniform(kb, (fan_out,), dtype, -bound, bound)
        return w, b

    w1s, b1s = linear(ks[0], ks[1], half, hidden_dim)
    w2s, b2s = linear(ks[2], ks[3], hidden_dim, half)
    w1t, b1t = linear(ks[4], ks[5], half, hidden_dim)
    w2t, b2t = linear(ks[6], ks[7], hidden_dim, half)
    return dict(w1s=w1s, b1s=b1s, w2s=w2s, b2s=b2s,
                w1t=w1t, b1t=b1t, w2t=w2t, b2t=b2t)


def reference_forward(x, params):
    """Pure-JAX reference mirroring the PyTorch forward (invert=False)."""
    dim = x.shape[1]
    half = dim // 2
    x1, x2 = x[:, :half], x[:, half:]
    s = jnp.tanh(jnp.maximum(x1 @ params["w1s"] + params["b1s"], 0.0)
                 @ params["w2s"] + params["b2s"])
    t = (jnp.maximum(x1 @ params["w1t"] + params["b1t"], 0.0)
         @ params["w2t"] + params["b2t"])
    y2 = x2 * jnp.exp(s) + t
    return jnp.concatenate([x1, y2], axis=1), jnp.sum(s, axis=1)


# TODO(synk): invert=True branch would be a second kernel computing
#             (x2 - t) * exp(-s) with no log-det output.
# TODO(synk): for large models, store x / weights in bf16 (keep f32 accumulation
#             and elementwise math) to halve HBM traffic on v6e/v7x.
# TODO(synk): when half < 128, the y2 store and second-layer MXU columns are
#             lane-masked; padding half to 128 or flipping to a feature-on-lane
#             transposed layout would make stores lane-dense.

if __name__ == "__main__":
    key = jax.random.PRNGKey(0)
    k_x, k_p, k_x2 = jax.random.split(key, 3)

    B, dim, hidden = 2, 8, 32
    x = jax.random.normal(k_x, (B, dim), dtype=jnp.float32)
    params = init_params(k_p, dim, hidden)

    y, logdet = coupling_layer_forward(x, params)
    jax.block_until_ready((y, logdet))

    y_ref, logdet_ref = reference_forward(x, params)
    assert jnp.allclose(y, y_ref, atol=1e-5, rtol=1e-5)
    assert jnp.allclose(logdet, logdet_ref, atol=1e-5, rtol=1e-5)

    # Exercise the tiled + padded batch path (grid > 1, ragged last tile).
    B2 = 1043
    x_big = jax.random.normal(k_x2, (B2, dim), dtype=jnp.float32)
    y_big, ld_big = coupling_layer_forward(x_big, params)
    jax.block_until_ready((y_big, ld_big))
    y_big_ref, ld_big_ref = reference_forward(x_big, params)
    assert jnp.allclose(y_big, y_big_ref, atol=1e-5, rtol=1e-5)
    assert jnp.allclose(ld_big, ld_big_ref, atol=1e-4, rtol=1e-5)

    print("KERNEL_OK")
</pallas_src>

<mosaic_0001>
module attributes {stable_mosaic.version = 11 : i64} {
  func.func @_coupling_fwd_kernel(%arg0: i32, %arg1: memref<2x8xf32, #tpu.memory_space<vmem>>, %arg2: memref<4x256xf32, #tpu.memory_space<vmem>>, %arg3: memref<1x256xf32, #tpu.memory_space<vmem>>, %arg4: memref<128x4xf32, #tpu.memory_space<vmem>>, %arg5: memref<1x4xf32, #tpu.memory_space<vmem>>, %arg6: memref<128x4xf32, #tpu.memory_space<vmem>>, %arg7: memref<1x4xf32, #tpu.memory_space<vmem>>, %arg8: memref<2x8xf32, #tpu.memory_space<vmem>>, %arg9: memref<2x1xf32, #tpu.memory_space<vmem>>) attributes {dimension_semantics = [#tpu.dimension_semantics<parallel>], iteration_bounds = array<i64: 1>, scalar_prefetch = 0 : i64, scratch_operands = 0 : i64, tpu.core_type = #tpu.core_type<tc>, window_params = [{transform_indices = @transform_0, window_bounds = array<i64: 2, 8>}, {pipeline_mode = #tpu.pipeline_mode<synchronous>, transform_indices = @transform_1, window_bounds = array<i64: 4, 256>}, {pipeline_mode = #tpu.pipeline_mode<synchronous>, transform_indices = @transform_2, window_bounds = array<i64: 1, 256>}, {pipeline_mode = #tpu.pipeline_mode<synchronous>, transform_indices = @transform_3, window_bounds = array<i64: 128, 4>}, {pipeline_mode = #tpu.pipeline_mode<synchronous>, transform_indices = @transform_4, window_bounds = array<i64: 1, 4>}, {pipeline_mode = #tpu.pipeline_mode<synchronous>, transform_indices = @transform_5, window_bounds = array<i64: 128, 4>}, {pipeline_mode = #tpu.pipeline_mode<synchronous>, transform_indices = @transform_6, window_bounds = array<i64: 1, 4>}, {transform_indices = @transform_7, window_bounds = array<i64: 2, 8>}, {transform_indices = @transform_8, window_bounds = array<i64: 2, 1>}]} {
    %c0 = arith.constant 0 : index
    %c0_0 = arith.constant 0 : index
    %0 = vector.load %arg1[%c0, %c0_0] : memref<2x8xf32, #tpu.memory_space<vmem>>, vector<2x8xf32>
    %1 = vector.extract_strided_slice %0 {offsets = [0, 0], sizes = [2, 4], strides = [1, 1]} : vector<2x8xf32> to vector<2x4xf32>
    %2 = vector.extract_strided_slice %0 {offsets = [0, 4], sizes = [2, 4], strides = [1, 1]} : vector<2x8xf32> to vector<2x4xf32>
    %c0_1 = arith.constant 0 : index
    %c0_2 = arith.constant 0 : index
    %3 = vector.load %arg2[%c0_1, %c0_2] : memref<4x256xf32, #tpu.memory_space<vmem>>, vector<4x256xf32>
    %cst = arith.constant dense<0.000000e+00> : vector<2x256xf32>
    %4 = tpu.matmul %1, %3, %cst {dimension_numbers = #tpu.dot_dimension_numbers<[1], [0], [0], [1], [0, 0, 1, 1], [], []>} : vector<2x4xf32>, vector<4x256xf32>, vector<2x256xf32> -> vector<2x256xf32>
    %c0_3 = arith.constant 0 : index
    %c0_4 = arith.constant 0 : index
    %5 = vector.load %arg3[%c0_3, %c0_4] : memref<1x256xf32, #tpu.memory_space<vmem>>, vector<1x256xf32>
    %6 = vector.broadcast %5 : vector<1x256xf32> to vector<2x256xf32>
    %7 = arith.addf %4, %6 : vector<2x256xf32>
    %cst_5 = arith.constant 0.000000e+00 : f32
    %8 = vector.broadcast %cst_5 : f32 to vector<2x256xf32>
    %9 = arith.maximumf %7, %8 : vector<2x256xf32>
    %10 = vector.extract_strided_slice %9 {offsets = [0, 0], sizes = [2, 128], strides = [1, 1]} : vector<2x256xf32> to vector<2x128xf32>
    %11 = vector.extract_strided_slice %9 {offsets = [0, 128], sizes = [2, 128], strides = [1, 1]} : vector<2x256xf32> to vector<2x128xf32>
    %c0_6 = arith.constant 0 : index
    %c0_7 = arith.constant 0 : index
    %12 = vector.load %arg4[%c0_6, %c0_7] : memref<128x4xf32, #tpu.memory_space<vmem>>, vector<128x4xf32>
    %cst_8 = arith.constant dense<0.000000e+00> : vector<2x4xf32>
    %13 = tpu.matmul %10, %12, %cst_8 {dimension_numbers = #tpu.dot_dimension_numbers<[1], [0], [0], [1], [0, 0, 1, 1], [], []>} : vector<2x128xf32>, vector<128x4xf32>, vector<2x4xf32> -> vector<2x4xf32>
    %c0_9 = arith.constant 0 : index
    %c0_10 = arith.constant 0 : index
    %14 = vector.load %arg5[%c0_9, %c0_10] : memref<1x4xf32, #tpu.memory_space<vmem>>, vector<1x4xf32>
    %15 = vector.broadcast %14 : vector<1x4xf32> to vector<2x4xf32>
    %16 = arith.addf %13, %15 : vector<2x4xf32>
    %17 = math.tanh %16 : vector<2x4xf32>
    %c0_11 = arith.constant 0 : index
    %c0_12 = arith.constant 0 : index
    %18 = vector.load %arg6[%c0_11, %c0_12] : memref<128x4xf32, #tpu.memory_space<vmem>>, vector<128x4xf32>
    %cst_13 = arith.constant dense<0.000000e+00> : vector<2x4xf32>
    %19 = tpu.matmul %11, %18, %cst_13 {dimension_numbers = #tpu.dot_dimension_numbers<[1], [0], [0], [1], [0, 0, 1, 1], [], []>} : vector<2x128xf32>, vector<128x4xf32>, vector<2x4xf32> -> vector<2x4xf32>
    %c0_14 = arith.constant 0 : index
    %c0_15 = arith.constant 0 : index
    %20 = vector.load %arg7[%c0_14, %c0_15] : memref<1x4xf32, #tpu.memory_space<vmem>>, vector<1x4xf32>
    %21 = vector.broadcast %20 : vector<1x4xf32> to vector<2x4xf32>
    %22 = arith.addf %19, %21 : vector<2x4xf32>
    %23 = math.exp %17 : vector<2x4xf32>
    %24 = arith.mulf %2, %23 : vector<2x4xf32>
    %25 = arith.addf %24, %22 : vector<2x4xf32>
    %c0_16 = arith.constant 0 : index
    %c0_17 = arith.constant 0 : index
    %26 = vector.load %arg8[%c0_16, %c0_17] : memref<2x8xf32, #tpu.memory_space<vmem>>, vector<2x4xf32>
    tpu.vector_store %arg8[%c0_16, %c0_17], %1 {strides = array<i32>} : memref<2x8xf32, #tpu.memory_space<vmem>>, vector<2x4xf32>,
    %c0_18 = arith.constant 0 : index
    %c4 = arith.constant 4 : index
    %27 = vector.load %arg8[%c0_18, %c4] : memref<2x8xf32, #tpu.memory_space<vmem>>, vector<2x4xf32>
    tpu.vector_store %arg8[%c0_18, %c4], %25 {strides = array<i32>} : memref<2x8xf32, #tpu.memory_space<vmem>>, vector<2x4xf32>,
    %cst_19 = arith.constant dense<0.000000e+00> : vector<2xf32>
    %28 = vector.multi_reduction <add>, %17, %cst_19 [1] : vector<2x4xf32> to vector<2xf32>
    %29 = vector.shape_cast %28 : vector<2xf32> to vector<2x1xf32>
    %c0_20 = arith.constant 0 : index
    %c0_21 = arith.constant 0 : index
    %30 = vector.load %arg9[%c0_20, %c0_21] : memref<2x1xf32, #tpu.memory_space<vmem>>, vector<2x1xf32>
    tpu.vector_store %arg9[%c0_20, %c0_21], %29 {strides = array<i32>} : memref<2x1xf32, #tpu.memory_space<vmem>>, vector<2x1xf32>,
    return
  }
  func.func @transform_0(%arg0: i32) -> (i32, i32) {
    %c0_i32 = arith.constant 0 : i32
    %c0_i32_0 = arith.constant 0 : i32
    return %arg0, %c0_i32 : i32, i32
  }
  func.func @transform_1(%arg0: i32) -> (i32, i32) {
    %c0_i32 = arith.constant 0 : i32
    %c0_i32_0 = arith.constant 0 : i32
    %c0_i32_1 = arith.constant 0 : i32
    return %c0_i32, %c0_i32_0 : i32, i32
  }
  func.func @transform_2(%arg0: i32) -> (i32, i32) {
    %c0_i32 = arith.constant 0 : i32
    %c0_i32_0 = arith.constant 0 : i32
    %c0_i32_1 = arith.constant 0 : i32
    return %c0_i32, %c0_i32_0 : i32, i32
  }
  func.func @transform_3(%arg0: i32) -> (i32, i32) {
    %c0_i32 = arith.constant 0 : i32
    %c0_i32_0 = arith.constant 0 : i32
    %c0_i32_1 = arith.constant 0 : i32
    return %c0_i32, %c0_i32_0 : i32, i32
  }
  func.func @transform_4(%arg0: i32) -> (i32, i32) {
    %c0_i32 = arith.constant 0 : i32
    %c0_i32_0 = arith.constant 0 : i32
    %c0_i32_1 = arith.constant 0 : i32
    return %c0_i32, %c0_i32_0 : i32, i32
  }
  func.func @transform_5(%arg0: i32) -> (i32, i32) {
    %c0_i32 = arith.constant 0 : i32
    %c0_i32_0 = arith.constant 0 : i32
    %c0_i32_1 = arith.constant 0 : i32
    return %c0_i32, %c0_i32_0 : i32, i32
  }
  func.func @transform_6(%arg0: i32) -> (i32, i32) {
    %c0_i32 = arith.constant 0 : i32
    %c0_i32_0 = arith.constant 0 : i32
    %c0_i32_1 = arith.constant 0 : i32
    return %c0_i32, %c0_i32_0 : i32, i32
  }
  func.func @transform_7(%arg0: i32) -> (i32, i32) {
    %c0_i32 = arith.constant 0 : i32
    %c0_i32_0 = arith.constant 0 : i32
    return %arg0, %c0_i32 : i32, i32
  }
  func.func @transform_8(%arg0: i32) -> (i32, i32) {
    %c0_i32 = arith.constant 0 : i32
    %c0_i32_0 = arith.constant 0 : i32
    return %arg0, %c0_i32 : i32, i32
  }
}

</mosaic_0001>

<bundles_post_ra>
// kernel: tpu_custom_call.1
= control target key start
LH: loop header
LB: loop body
LE: loop exit
PB: predicated region body
PF: predicated region fallthrough
CT: control target
= control target key end

     0   :  { %vm49_vm0 = vcmask 1043456   ;;  %v544_v3 = vmov 0.0   ;;  %vm45_vm1 = vcmask 31744   ;;  %v545_v7 = vmov 0.0|0.0   ;;  %s746_s0 = inlined_call_operand.vmem [shape: f32[2,8], index: 0, kind: input, shape index: {}]   ;;  %s747_s1 = inlined_call_operand.vmem [shape: f32[4,256], index: 1, kind: input, shape index: {}]   ;;  %s748_s2 = inlined_call_operand.vmem [shape: f32[1,256], index: 2, kind: input, shape index: {}]   ;;  %s749_s3 = inlined_call_operand.vmem [shape: f32[128,4], index: 3, kind: input, shape index: {}]   ;;  %s750_s4 = inlined_call_operand.vmem [shape: f32[1,4], index: 4, kind: input, shape index: {}]   ;;  %s751_s5 = inlined_call_operand.vmem [shape: f32[128,4], index: 5, kind: input, shape index: {}]   ;;  %s752_s6 = inlined_call_operand.vmem [shape: f32[1,4], index: 6, kind: input, shape index: {}]   ;;  %s753_s7 = inlined_call_operand.hbm [shape: f32[2,8], index: 7, kind: output, shape index: {0}]   ;;  %s754_s8 = inlined_call_operand.vmem [shape: f32[2,1], index: 8, kind: output, shape index: {1}]  }
   0x1   :  { %v30_v0 = vld [vmem:[%s747_s1] sm:$0xff]  ;;  %118 = vmatprep.mubr.f32.mxu0 %v544_v3  ;;  %v128_v5 = vld [vmem:[%s749_s3 + $0x8] sm:$0xff]  ;;  %462 = vmatprep.subr.bf16.mxu1 %v545_v7  ;;  %v129_v10 = vld [vmem:[%s749_s3 + $0x10] sm:$0xff] }
   0x2   :  { %v600_v1 = vld [vmem:[%s746_s0] sm:$0x3]  ;;  %v44_v2 = vcombine.high %v30_v0, %v30_v0  ;;  %v222_v9 = vld [vmem:[%s751_s5 + $0x8] sm:$0xff]  ;;  %v130_v11 = vld [vmem:[%s749_s3 + $0x18] sm:$0xff] }
   0x3   :  { %v127_v4 = vld [vmem:[%s749_s3] sm:$0xff]  ;;  %v223_v13 = vld [vmem:[%s751_s5 + $0x10] sm:$0xff]  ;;  %v224_v14 = vld [vmem:[%s751_s5 + $0x18] sm:$0xff]  ;;  %v466_v15 = vpack.c.bf16 %v130_v11, %v129_v10 }
   0x4   :  { %v221_v6 = vld [vmem:[%s751_s5] sm:$0xff]  ;;  %v463_v8 = vpack.c.bf16 %v128_v5, %v127_v4  ;;  %353 = vmatprep.subr.msk.mxu0 %vm49_vm0, %v44_v2  ;;  %v132_v17 = vld [vmem:[%s749_s3 + $0x28] sm:$0xff]  ;;  %v490_v18 = vpack.c.bf16 %v224_v14, %v223_v13  ;;  %v133_v22 = vld [vmem:[%s749_s3 + $0x30] sm:$0xff] }
   0x5   :  { %v487_v12 = vpack.c.bf16 %v222_v9, %v221_v6  ;;  %354 = vmatpush1.msk.msra.mxu0 %vm49_vm0, %v30_v0  ;;  %v131_v16 = vld [vmem:[%s749_s3 + $0x20] sm:$0xff]  ;;  %v226_v20 = vld [vmem:[%s751_s5 + $0x28] sm:$0xff]  ;;  %v134_v23 = vld [vmem:[%s749_s3 + $0x38] sm:$0xff] }
   0x6   :  { %464 = vmatpush3.bf16.msra.mxu1 %v463_v8  ;;  %355 = vmatmul.mubr.msk.f32.vlgmr.msra.gmra.mrb[0].mxu0 %vm45_vm1, %v600_v1  ;;  %v225_v19 = vld [vmem:[%s751_s5 + $0x20] sm:$0xff]  ;;  %v469_v21 = vpack.c.bf16 %v132_v17, %v131_v16 }
   0x7   :  { %486 = vmatprep.subr.bf16.mxu0 %v545_v7  ;;  %465 = vmatprep.subr.bf16.mxu1 %v545_v7  ;;  %v493_v24 = vpack.c.bf16 %v226_v20, %v225_v19 }
   0x8   :  { %488 = vmatpush3.bf16.msra.mxu0 %v487_v12 }
   0x9   :  { %489 = vmatprep.subr.bf16.mxu0 %v545_v7 }
   0xa   :  { %467 = vmatpush3.bf16.msra.mxu1 %v466_v15 }
   0xb   :  { %468 = vmatprep.subr.bf16.mxu1 %v545_v7 }
   0xc   :  { %491 = vmatpush3.bf16.msra.mxu0 %v490_v18 }
   0xd   :  { %14 = vsyncpa [#allocation3], 0  ;;  %492 = vmatprep.subr.bf16.mxu0 %v545_v7  ;;  %v227_v25 = vld [vmem:[%s751_s5 + $0x30] sm:$0xff]  ;;  %v228_v26 = vld [vmem:[%s751_s5 + $0x38] sm:$0xff]  ;;  %v472_v27 = vpack.c.bf16 %v134_v23, %v133_v22  ;;  %vm546_vm2 = vmmov 0   ;;  %v33_v53 = vlaneseq  ;;  %vm326_vm3 = vcmask 25600  }
   0xe   :  { %470 = vmatpush3.bf16.msra.mxu1 %v469_v21  ;;  %v135_v28 = vld [vmem:[%s749_s3 + $0x40] sm:$0xff]  ;;  %v136_v29 = vld [vmem:[%s749_s3 + $0x48] sm:$0xff]  ;;  %v496_v30 = vpack.c.bf16 %v228_v26, %v227_v25  ;;  %v137_v34 = vld [vmem:[%s749_s3 + $0x50] sm:$0xff]  ;;  %424 = vmatprep.mubr.msk.f32.mxu1 %vm546_vm2, %v544_v3  ;;  %327 = vst.msk [vmem:[#allocation2] sm:$0x3] %vm326_vm3, %v600_v1  ;;  %s547_s26 = smov 4  }
   0xf   :  { %471 = vmatprep.subr.bf16.mxu1 %v545_v7  ;;  %v229_v31 = vld [vmem:[%s751_s5 + $0x40] sm:$0xff]  ;;  %v230_v32 = vld [vmem:[%s751_s5 + $0x48] sm:$0xff]  ;;  %v475_v33 = vpack.c.bf16 %v136_v29, %v135_v28  ;;  %v138_v35 = vld [vmem:[%s749_s3 + $0x58] sm:$0xff]  ;;  %459 = vmatprep.mubr.msk.f32.mxu0 %vm546_vm2, %v544_v3  ;;  %v34_v54 = vshrl.u32 %v33_v53, 7  ;;  %vm333_vm4 = vcmask 1024   ;;  %s548_s27 = smov [#allocation2]  }
  0x10   :  { %494 = vmatpush3.bf16.msra.mxu0 %v493_v24  ;;  %v499_v36 = vpack.c.bf16 %v230_v32, %v229_v31  ;;  %v231_v37 = vld [vmem:[%s751_s5 + $0x50] sm:$0xff]  ;;  %v232_v38 = vld [vmem:[%s751_s5 + $0x58] sm:$0xff]  ;;  %v478_v39 = vpack.c.bf16 %v138_v35, %v137_v34  ;;  %v139_v40 = vld [vmem:[%s749_s3 + $0x60] sm:$0xff]  ;;  %s341_s28 = sshll.u32 %s548_s27, 4  ;;  %vm328_vm5 = vcmask 58400   ;;  %s342_s28 = int_to_ptr.vmem [resolvable:$true] %s341_s28 }
  0x11   :  { %495 = vmatprep.subr.bf16.mxu0 %v545_v7  ;;  %v140_v41 = vld [vmem:[%s749_s3 + $0x68] sm:$0xff]  ;;  %v502_v42 = vpack.c.bf16 %v232_v38, %v231_v37  ;;  %v233_v43 = vld [vmem:[%s751_s5 + $0x60] sm:$0xff]  ;;  %v141_v47 = vld [vmem:[%s749_s3 + $0x70] sm:$0xff]  ;;  %v35_v55 = vsub.s32 0, %v34_v54  ;;  %v39_v57 = vsub.s32 1, %v34_v54  ;;  %s520_s29 = scalar_lea.vmem %s342_s28, 32  ;;  %p525_p1 = scmp.lt.s32.totalorder %s342_s28, %s342_s28 }
  0x12   :  { %473 = vmatpush3.bf16.msra.mxu1 %v472_v27  ;;  %v234_v44 = vld [vmem:[%s751_s5 + $0x68] sm:$0xff]  ;;  %v481_v45 = vpack.c.bf16 %v140_v41, %v139_v40  ;;  %v142_v48 = vld [vmem:[%s749_s3 + $0x78] sm:$0xff]  ;;  %v235_v50 = vld [vmem:[%s751_s5 + $0x70] sm:$0xff]  ;;  %p521_p0 = scmp.ne.s32.totalorder %s342_s28, %s520_s29  ;;  %p526_p2 = scmp.lt.s32.totalorder %s520_s29, %s520_s29 }
  0x13   :  { %474 = vmatprep.subr.bf16.mxu1 %v545_v7  ;;  %v505_v46 = vpack.c.bf16 %v234_v44, %v233_v43  ;;  %v484_v49 = vpack.c.bf16 %v142_v48, %v141_v47  ;;  %v236_v51 = vld [vmem:[%s751_s5 + $0x78] sm:$0xff]  ;;  %v31_v56 = vld [vmem:[%s748_s2] sm:$0x3] }
  0x14   :  { %497 = vmatpush3.bf16.msra.mxu0 %v496_v30  ;;  %v508_v52 = vpack.c.bf16 %v236_v51, %v235_v50  ;;  %v36_v58 = vrot.slane %v31_v56, %v35_v55  ;;  %v40_v59 = vrot.slane %v31_v56, %v39_v57  ;;  %v356_v3 = vld [vmem:[%s750_s4] ss:$0 sm:$0xff]  ;;  %p527_p3 = por %p526_p2, %p525_p1 }
  0x15   :  { %498 = vmatprep.subr.bf16.mxu0 %v545_v7  ;;  %v357_v4 = vld [vmem:[%s752_s6] ss:$0 sm:$0xff] }
  0x16   :  { %476 = vmatpush3.bf16.msra.mxu1 %v475_v33  ;;  %p528_p4 = pnand %p527_p3, %p521_p0 }
  0x17   :  { %477 = vmatprep.subr.bf16.mxu1 %v545_v7 }
  0x18   :  { %500 = vmatpush3.bf16.msra.mxu0 %v499_v36 }
  0x19   :  { %501 = vmatprep.subr.bf16.mxu0 %v545_v7 }
  0x1a   :  { %479 = vmatpush3.bf16.msra.mxu1 %v478_v39 }
  0x1b   :  { %480 = vmatprep.subr.bf16.mxu1 %v545_v7 }
  0x1c   :  { %503 = vmatpush3.bf16.msra.mxu0 %v502_v42 }
  0x1d   :  { %504 = vmatprep.subr.bf16.mxu0 %v545_v7 }
  0x1e   :  { %482 = vmatpush3.bf16.msra.mxu1 %v481_v45 }
  0x1f   :  { %483 = vmatprep.subr.bf16.mxu1 %v545_v7 }
  0x20   :  { %506 = vmatpush3.bf16.msra.mxu0 %v505_v46 }
  0x21   :  { %507 = vmatprep.subr.bf16.mxu0 %v545_v7 }
  0x22   :  { %485 = vmatpush3.bf16.msra.mxu1 %v484_v49 }
  0x24   :  { %509 = vmatpush3.bf16.msra.mxu0 %v508_v52 }
  0xd9   :  { %v120_v60 = vpop.f32.mrb[0].mxu0 }
  0xda   :  { %v121_v61 = vadd.f32 %v120_v60, %v36_v58  ;;  %v122_v62 = vpop.f32.mrb[1].mxu0 }
  0xdb   :  { %v123_v63 = vadd.f32 %v122_v62, %v40_v59 }
  0xdc   :  { %v125_v0 = vmax.f32 %v121_v61, 0.0 }
  0xdd   :  { %v126_v2 = vmax.f32 %v123_v63, 0.0 }
  0xde   :  { %425 = vmatmul.mubr.f32.vlgmr.msra.gmra.mrb[0].mxu1 %v125_v0 }
  0xdf   :  { %460 = vmatmul.mubr.f32.vlgmr.msra.gmra.mrb[2].mxu0 %v126_v2 }
 0x1b1   :  { %v216_v5 = vpop.f32.mrb[0].mxu1 }
 0x1b2   :  { %v217_v6 = vadd.f32 %v356_v3, %v216_v5  ;;  %v426_v7 = vpop.f32.mrb[1].mxu1  ;;  %v310_v8 = vpop.f32.mrb[2].mxu0 }
 0x1b3   :  { %v311_v9 = vadd.f32 %v357_v4, %v310_v8  ;;  %v461_v10 = vpop.f32.mrb[3].mxu0 }
 0x1b4   :  { %516 = vtanh.f32 %v217_v6 }
 0x1b5   :  { %322 = vrot.lane.b32.xlu1 %v311_v9, %s547_s26 }
 0x1be   :  { %v517_v11 = vpop.eup %516 }
 0x1bf   :  { %v330_v12 = vsel %vm326_vm3, %v517_v11, 0.0  ;;  %v314_v13 = vmul.f32 1.442695, %v517_v11 }
 0x1c0   :  { %331 = vadd.xlane.f32.xlu0 %v330_v12 }
 0x1c1   :  { %518 = vpow2.f32 %v314_v13 }
 0x1cb   :  { %v519_v14 = vpop.eup %518 }
 0x1d6   :  { %317 = vrot.lane.b32.xlu0 %v519_v14, %s547_s26 }
 0x227   :  { %v323_v18 = vpop.permute.xlu1 %322 }
 0x24d   :  { %v332_v15 = vpop.xlane.xlu0 %331 }
 0x24e   :  { %334 = vst.msk [vmem:[%s754_s8] sm:$0x3] %vm333_vm4, %v332_v15 }
 0x251   :  { %v318_v16 = vpop.permute.xlu0 %317 }
 0x252   :  { %v320_v17 = vmul.f32 %v318_v16, %v600_v1 }
 0x254   :  { %v325_v19 = vadd.f32 %v323_v18, %v320_v17 }
 0x256   :  { %329 = vst.msk [vmem:[#allocation2] sm:$0x3] %vm328_vm5, %v325_v19 }
 0x257   :  { %531 = shalt.err (!%p528_p4)
}
 0x258   :  { %s532_s8 = scalar_lea.hbm %s753_s7, 32 }
 0x259   :  { %p533_p5 = scmp.ne.s32.totalorder %s753_s7, %s532_s8  ;;  %p536_p6 = scmp.lt.u32.totalorder %s532_s8, %s753_s7 }
 0x25b   :  { %p538_p7 = pnand %p536_p6, %p533_p5 }
 0x25d   :  { %541 = shalt.err (!%p538_p7)
}
 0x25e   :  { %344 = dma.vmem_to_hbm [thread:$0]  %s342_s28, 32, %s753_s7, [#allocation3]  }
 0x25f   :  { %542 = dma.done.wait [#allocation3], 32  }
 0x260   :  { %543 = vsyncadd [#allocation3], 4294967264 }
 0x261   :  { %352 = vsyncpa [#allocation3], 1 }

</bundles_post_ra>
